<compile_context>
chip_gen: v7x
topology: tpu7x:2x2x1
jax: 0.10.0
libtpu: 0.0.40
codegen_flags: <defaults>
</compile_context>

<pallas_src>
import jax
import jax.numpy as jnp
from jax.experimental import pallas as pl
from jax.experimental.pallas import tpu as pltpu

NEG_SLOPE = 0.1  # leaky_relu negative_slope used by ReLULayer


def _leaky(x):
    # max(x, 0.1*x) == leaky_relu(x, 0.1) for 0 < slope < 1: mul+max (2 VALU ops)
    # instead of cmp+mul+select (3 VALU ops).
    return jnp.maximum(x, NEG_SLOPE * x)


def _round_up(x, m):
    return (x + m - 1) // m * m


def _coord_contrib(w_c, x):
    """w_c: (H, in_features) f32, x: (in_features, tm) f32 -> (H, tm) f32.

    For tiny in_features (coords are 2-D) a VPU broadcast-multiply beats a skinny
    K=2 MXU matmul; fall back to jnp.dot otherwise.
    """
    in_features = w_c.shape[1]
    if in_features <= 4:
        acc = w_c[:, 0:1] * x[0:1, :]
        for c in range(1, in_features):
            acc = acc + w_c[:, c : c + 1] * x[c : c + 1, :]
        return acc
    return jnp.dot(w_c.astype(x.dtype), x, preferred_element_type=jnp.float32)


def make_mlp_kernel(plan, has_skip):
    """Build the in-kernel MLP (transposed layout: activations are (features, rows)).

    Ref order: (coords, b_eff_first, [b_eff_skip], *flat_weights, out).
    plan: list of dicts {'kind': 'first'|'skip'|'dense', 'leaky': bool}.
    Elementwise / bias / coord work stays f32 (v5e-safe); matmul inputs are cast to the
    weight dtype (bf16 fast path on v6e/v7x) and accumulate in f32.
    """

    def kernel(*refs):
        coords_ref = refs[0]
        b_first_ref = refs[1]
        if has_skip:
            b_skip_ref = refs[2]
            wrefs = refs[3:-1]
        else:
            b_skip_ref = None
            wrefs = refs[2:-1]
        out_ref = refs[-1]

        x = coords_ref[...][0]          # (in_features, tm) f32 -- rows on lanes
        h = None                        # f32 activations
        pos = 0
        for spec in plan:
            kind = spec["kind"]
            if kind == "first":
                w_c = wrefs[pos][...]
                pos += 1
                # (H,1) bias broadcast happens exactly once per grid step (no repeat).
                z = _coord_contrib(w_c, x) + b_first_ref[...][0]
            elif kind == "skip":
                w_h = wrefs[pos][...]
                w_c = wrefs[pos + 1][...]
                pos += 2
                # cat([h, xf]) @ W == h @ W_h + coords @ W_xc + const @ W_xconst
                # (const part pre-folded into b_eff_skip; omega pre-folded into W)
                z = (jnp.dot(w_h, h.astype(w_h.dtype),
                             preferred_element_type=jnp.float32)
                     + _coord_contrib(w_c, x)
                     + b_skip_ref[...][0])
            else:  # 'dense' (hidden or final; final is an M=1 dot -- MXU has slack)
                w = wrefs[pos][...]
                b = wrefs[pos + 1][...]        # bias kept f32
                pos += 2
                z = jnp.dot(w, h.astype(w.dtype),
                            preferred_element_type=jnp.float32) + b
            h = _leaky(z) if spec["leaky"] else z      # f32 elementwise

        out_ref[...] = h[None].astype(out_ref.dtype)

    return kernel


def prepare_kernel_params(layers, const_feat, *, in_features, omega, outermost_linear,
                          weight_dtype=jnp.float32):
    """Fold omega + per-batch constant features into the weights / effective biases.

    Weights are pre-transposed to (out, in) so the kernel computes W @ h with h in
    (features, rows) layout.  Only the MXU-fed weights (H x H hidden and the final
    layer) are cast to `weight_dtype`; coord-part weights and all biases stay f32.
    Returns (plan, flat, b_eff_first, b_eff_skip, out_features).
    """
    n = len(layers)
    plan, flat = [], []
    b_eff_first = None
    b_eff_skip = None
    for li, entry in enumerate(layers):
        is_last = li == n - 1
        scale = 1.0 if is_last else omega
        leaky = (not is_last) or (not outermost_linear)
        if li == 0:
            w, b = entry[1], entry[2]                                    # (d_in,H),(1,H)
            b_eff_first = (scale * const_feat) @ w[in_features:] + b[0]  # (bs, H) f32
            flat.append(jnp.transpose(scale * w[:in_features]))          # (H, in_f) f32
            plan.append({"kind": "first", "leaky": leaky})
        elif entry[0] == "skip":
            w_h, w_x, b = entry[1], entry[2], entry[3]                # (H,H),(d_in,H),(1,H)
            b_eff_skip = (scale * const_feat) @ w_x[in_features:] + b[0]
            flat.append(jnp.transpose(scale * w_h).astype(weight_dtype))  # (H, H)
            flat.append(jnp.transpose(scale * w_x[:in_features]))         # (H, in_f) f32
            plan.append({"kind": "skip", "leaky": leaky})
        else:
            w, b = entry[1], entry[2]
            flat.append(jnp.transpose(scale * w).astype(weight_dtype))    # (H_out, H_in)
            flat.append(jnp.transpose(b))                                 # (H_out, 1) f32
            plan.append({"kind": "dense", "leaky": leaky})
    out_features = layers[-1][-1].shape[-1]
    return plan, flat, b_eff_first, b_eff_skip, out_features


def plan_tiling(wh, bs, target=2048):
    """Pick (tm, wh_pad): a 128-aligned row tile with <=128 rows of grid padding and,
    when possible, at least 2 parallel grid tiles so both v7x TensorCores get work."""
    u = _round_up(wh, 128) // 128                 # wh in 128-row units
    max_units = max(1, min(u, max(1, target // 128)))
    tm_units = 1
    for cand in range(max_units, 0, -1):          # largest tile with waste <= 1 unit
        n = -(-u // cand)
        if n * cand - u <= 1:
            tm_units = cand
            break
    n_tiles = -(-u // tm_units)
    if bs * n_tiles < 2 and u >= 2:               # keep both v7x TCs busy for bs == 1
        tm_units = -(-u // 2)
        n_tiles = 2
    tm = tm_units * 128
    return tm, n_tiles * tm


def prepare_coords(coords, wh_pad):
    """(bs, wh, in_f) -> (bs, in_f, wh_pad).  Hoisted out of run_mlp so a static
    coordinate grid is transposed/padded ONCE and reused across forward calls."""
    bs, wh, _ = coords.shape
    coords_t = jnp.swapaxes(coords, 1, 2)
    if wh_pad != wh:
        coords_t = jnp.pad(coords_t, ((0, 0), (0, 0), (0, wh_pad - wh)))
    return coords_t


def run_mlp(coords, b_eff_first, b_eff_skip, flat, plan, out_features, *,
            tm_target=2048, coords_t=None):
    """coords: (bs, wh, in_features) raw coordinates (the only per-row HBM input)."""
    bs, wh, in_features = coords.shape
    tm, wh_pad = plan_tiling(wh, bs, tm_target)
    if coords_t is None:
        coords_t = prepare_coords(coords, wh_pad)
    assert coords_t.shape == (bs, in_features, wh_pad), (
        f"coords_t {coords_t.shape} != {(bs, in_features, wh_pad)}; "
        f"prepare it with plan_tiling(wh={wh}, bs={bs}, target={tm_target})")

    inputs = [coords_t, b_eff_first[:, :, None]]
    in_specs = [
        pl.BlockSpec((1, in_features, tm), lambda b, j: (b, 0, j)),
        pl.BlockSpec((1, b_eff_first.shape[1], 1), lambda b, j: (b, 0, 0)),
    ]
    has_skip = b_eff_skip is not None
    if has_skip:
        inputs.append(b_eff_skip[:, :, None])
        in_specs.append(pl.BlockSpec((1, b_eff_skip.shape[1], 1), lambda b, j: (b, 0, 0)))
    for a in flat:
        inputs.append(a)
        # grid-invariant weight/bias tiles: whole array, constant block index
        in_specs.append(pl.BlockSpec(a.shape, lambda b, j: (0, 0)))

    # Honest VMEM budget: weights (x2 buffers) + double-buffered coord/out tiles +
    # activation working set + margin; clamp to <= 32 MiB (half of v7x's 64 MiB VMEM).
    H = b_eff_first.shape[1]
    flat_bytes = sum(int(a.size) * a.dtype.itemsize for a in flat)
    est = (2 * flat_bytes
           + 4 * (in_features + out_features) * tm * 4
           + 8 * H * tm * 4
           + (2 << 20))
    vmem_limit = int(min(32 << 20, max(16 << 20, est)))

    out_t = pl.pallas_call(
        make_mlp_kernel(plan, has_skip),
        out_shape=jax.ShapeDtypeStruct((bs, out_features, wh_pad), jnp.float32),
        grid_spec=pltpu.PrefetchScalarGridSpec(
            num_scalar_prefetch=0,
            grid=(bs, wh_pad // tm),
            in_specs=in_specs,
            out_specs=pl.BlockSpec((1, out_features, tm), lambda b, j: (b, 0, j)),
        ),
        compiler_params=pltpu.CompilerParams(
            dimension_semantics=("parallel", "parallel"),
            vmem_limit_bytes=vmem_limit,
        ),
    )(*inputs)

    return jnp.swapaxes(out_t, 1, 2)[:, :wh, :]                 # (bs, wh, out_features)


def init_params(key, *, in_features, hidden_features, hidden_layers, out_features,
                outermost_linear, num_embed, num_glyphs, embed_features=32,
                first_omega_0=30.0, hidden_omega_0=30.0):
    """Deterministic init mimicking the PyTorch module's shapes/ranges."""
    keys = list(jax.random.split(key, 4 + 2 * (hidden_layers + 2)))
    kit = iter(keys)

    params = {"embed": jax.random.normal(next(kit), (num_embed, embed_features), jnp.float32)}

    d_in = in_features + embed_features + num_glyphs
    H = hidden_features

    def relu_layer(k, fan_in, fan_out, omega0):
        kw, kb = jax.random.split(k)
        bound_w = (1.0 / (omega0 * fan_in)) if omega0 > 1 else float(fan_in) ** -0.5
        w = jax.random.uniform(kw, (fan_in, fan_out), jnp.float32, -bound_w, bound_w)
        bound_b = float(fan_in) ** -0.5
        b = jax.random.uniform(kb, (1, fan_out), jnp.float32, -bound_b, bound_b)
        return w, b

    layers = []
    w, b = relu_layer(next(kit), d_in, H, first_omega_0)          # net[0]
    layers.append(("dense", w, b))
    for i in range(hidden_layers):
        if i == hidden_layers // 2:
            w, b = relu_layer(next(kit), H + d_in, H, hidden_omega_0)
            layers.append(("skip", w[:H], w[H:], b))              # split cat([h, xf]) weight
        else:
            w, b = relu_layer(next(kit), H, H, hidden_omega_0)
            layers.append(("dense", w, b))
    if outermost_linear:
        bound = float(H) ** -0.5
        kw, kb = jax.random.split(next(kit))
        w = jax.random.uniform(kw, (H, out_features), jnp.float32, -bound, bound)
        b = jax.random.uniform(kb, (1, out_features), jnp.float32, -bound, bound)
        layers.append(("dense", w, b))
    params["layers"] = layers
    return params


def auto_decoder_family_forward(params, idx, glyph_idx, inputs, *, outermost_linear,
                                omega=30.0, tm_target=2048,
                                weight_dtype=jnp.float32, coords_t=None):
    bs, wh, in_features = inputs.shape
    label_embed = params["embed"][idx]                                   # (bs, E)
    # per-batch constant features, in the same order they are concatenated:
    # x = cat([coords, glyph_onehot, label_embed], -1)
    const_feat = jnp.concatenate(
        [glyph_idx.astype(inputs.dtype), label_embed], axis=-1)          # (bs, G+E)
    plan, flat, b_eff_first, b_eff_skip, out_features = prepare_kernel_params(
        params["layers"], const_feat, in_features=in_features,
        omega=omega, outermost_linear=outermost_linear, weight_dtype=weight_dtype)
    out = run_mlp(inputs, b_eff_first, b_eff_skip, flat, plan, out_features,
                  tm_target=tm_target, coords_t=coords_t)
    # matches torch: ((network_output, coords), label_embed)
    # (torch's input.clone().requires_grad_(True) is autograd bookkeeping only)
    return (out, inputs), label_embed


def reference_forward(params, idx, glyph_idx, inputs, *, outermost_linear, omega=30.0):
    """Pure-JAX reference reproducing the PyTorch forward exactly (for validation)."""
    bs, wh, _ = inputs.shape
    label_embed = params["embed"][idx]
    label_rep = jnp.broadcast_to(label_embed[:, None, :], (bs, wh, label_embed.shape[-1]))
    glyph_rep = jnp.broadcast_to(glyph_idx[:, None, :].astype(inputs.dtype),
                                 (bs, wh, glyph_idx.shape[-1]))
    x_fused = jnp.concatenate([inputs, glyph_rep, label_rep], axis=-1)    # (bs, wh, d_in)
    layers = params["layers"]
    n = len(layers)
    h = x_fused
    for li, entry in enumerate(layers):
        is_last = li == n - 1
        scale = 1.0 if is_last else omega
        if entry[0] == "skip":
            w = jnp.concatenate([entry[1], entry[2]], axis=0)
            hh = jnp.concatenate([h, x_fused], axis=-1)
            z = (hh * scale) @ w + entry[3][0]
        else:
            z = (h * scale) @ entry[1] + entry[2][0]
        h = z if (is_last and outermost_linear) else jnp.where(z > 0, z, NEG_SLOPE * z)
    return (h, inputs), label_embed


if __name__ == "__main__":
    # small instantiation consistent with the module
    in_features = 2          # 2-D coords
    hidden_features = 64
    hidden_layers = 3
    out_features = 1
    num_embed = 2
    num_glyphs = 26
    outermost_linear = True
    bs, wh = 2, 16           # wh is padded to the 128-lane row tile inside run_mlp

    key = jax.random.PRNGKey(0)
    kp, k_in, k_idx, k_gl = jax.random.split(key, 4)

    params = init_params(
        kp, in_features=in_features, hidden_features=hidden_features,
        hidden_layers=hidden_layers, out_features=out_features,
        outermost_linear=outermost_linear, num_embed=num_embed, num_glyphs=num_glyphs)

    inputs = jax.random.uniform(k_in, (bs, wh, in_features), jnp.float32, -1.0, 1.0)
    idx = jax.random.randint(k_idx, (bs,), 0, num_embed)
    glyph_idx = jax.nn.one_hot(
        jax.random.randint(k_gl, (bs,), 0, num_glyphs), num_glyphs, dtype=jnp.float32)

    (ref_out, _), _ = reference_forward(
        params, idx, glyph_idx, inputs, outermost_linear=outermost_linear)

    # --- fp32 kernel: strict parity with the PyTorch-equivalent reference ----------
    (out_f32, coords_back), label_embed = auto_decoder_family_forward(
        params, idx, glyph_idx, inputs, outermost_linear=outermost_linear,
        weight_dtype=jnp.float32)
    jax.block_until_ready(out_f32)
    err32 = float(jnp.max(jnp.abs(out_f32 - ref_out)))
    assert out_f32.shape == (bs, wh, out_features), out_f32.shape
    assert label_embed.shape == (bs, 32), label_embed.shape
    assert err32 < 1e-4, f"f32 max err {err32}"

    # --- bf16-weight kernel (MXU fast path on v6e/v7x): loosened parity check ------
    # Demonstrate the cached-coords path: transpose/pad the (static) coordinate grid
    # once and reuse it across calls.
    tm_sel, wh_pad = plan_tiling(wh, bs)
    coords_t_cached = prepare_coords(inputs, wh_pad)
    (out_bf16, _), _ = auto_decoder_family_forward(
        params, idx, glyph_idx, inputs, outermost_linear=outermost_linear,
        weight_dtype=jnp.bfloat16, coords_t=coords_t_cached)
    jax.block_until_ready(out_bf16)
    errbf = float(jnp.max(jnp.abs(out_bf16 - ref_out)))
    # bf16 weights / matmul inputs (f32 accumulation): tolerance loosened vs the fp32
    # reference, as documented in the perf review.
    tol_bf = 5e-2 + 5e-2 * float(jnp.max(jnp.abs(ref_out)))
    assert bool(jnp.all(jnp.isfinite(out_bf16)))
    assert errbf < tol_bf, f"bf16 max err {errbf} (tol {tol_bf})"

    print("KERNEL_OK")
</pallas_src>

<mosaic_0001>
module attributes {stable_mosaic.version = 11 : i64} {
  func.func @kernel(%arg0: i32, %arg1: i32, %arg2: memref<1x2x128xf32, #tpu.memory_space<vmem>>, %arg3: memref<1x64x1xf32, #tpu.memory_space<vmem>>, %arg4: memref<1x64x1xf32, #tpu.memory_space<vmem>>, %arg5: memref<64x2xf32, #tpu.memory_space<vmem>>, %arg6: memref<64x64xf32, #tpu.memory_space<vmem>>, %arg7: memref<64x1xf32, #tpu.memory_space<vmem>>, %arg8: memref<64x64xf32, #tpu.memory_space<vmem>>, %arg9: memref<64x2xf32, #tpu.memory_space<vmem>>, %arg10: memref<64x64xf32, #tpu.memory_space<vmem>>, %arg11: memref<64x1xf32, #tpu.memory_space<vmem>>, %arg12: memref<1x64xf32, #tpu.memory_space<vmem>>, %arg13: memref<1x1xf32, #tpu.memory_space<vmem>>, %arg14: memref<1x1x128xf32, #tpu.memory_space<vmem>>) attributes {dimension_semantics = [#tpu.dimension_semantics<parallel>, #tpu.dimension_semantics<parallel>], iteration_bounds = array<i64: 2, 1>, scalar_prefetch = 0 : i64, scratch_operands = 0 : i64, tpu.core_type = #tpu.core_type<tc>, window_params = [{transform_indices = @transform_0, window_bounds = array<i64: 1, 2, 128>}, {transform_indices = @transform_1, window_bounds = array<i64: 1, 64, 1>}, {transform_indices = @transform_2, window_bounds = array<i64: 1, 64, 1>}, {pipeline_mode = #tpu.pipeline_mode<synchronous>, transform_indices = @transform_3, window_bounds = array<i64: 64, 2>}, {pipeline_mode = #tpu.pipeline_mode<synchronous>, transform_indices = @transform_4, window_bounds = array<i64: 64, 64>}, {pipeline_mode = #tpu.pipeline_mode<synchronous>, transform_indices = @transform_5, window_bounds = array<i64: 64, 1>}, {pipeline_mode = #tpu.pipeline_mode<synchronous>, transform_indices = @transform_6, window_bounds = array<i64: 64, 64>}, {pipeline_mode = #tpu.pipeline_mode<synchronous>, transform_indices = @transform_7, window_bounds = array<i64: 64, 2>}, {pipeline_mode = #tpu.pipeline_mode<synchronous>, transform_indices = @transform_8, window_bounds = array<i64: 64, 64>}, {pipeline_mode = #tpu.pipeline_mode<synchronous>, transform_indices = @transform_9, window_bounds = array<i64: 64, 1>}, {pipeline_mode = #tpu.pipeline_mode<synchronous>, transform_indices = @transform_10, window_bounds = array<i64: 1, 64>}, {pipeline_mode = #tpu.pipeline_mode<synchronous>, transform_indices = @transform_11, window_bounds = array<i64: 1, 1>}, {transform_indices = @transform_12, window_bounds = array<i64: 1, 1, 128>}]} {
    %c0 = arith.constant 0 : index
    %c0_0 = arith.constant 0 : index
    %c0_1 = arith.constant 0 : index
    %0 = vector.load %arg2[%c0, %c0_0, %c0_1] : memref<1x2x128xf32, #tpu.memory_space<vmem>>, vector<1x2x128xf32>
    %1 = vector.shape_cast %0 : vector<1x2x128xf32> to vector<2x128xf32>
    %c0_2 = arith.constant 0 : index
    %c0_3 = arith.constant 0 : index
    %2 = vector.load %arg5[%c0_2, %c0_3] : memref<64x2xf32, #tpu.memory_space<vmem>>, vector<64x2xf32>
    %3 = vector.extract_strided_slice %2 {offsets = [0, 0], sizes = [64, 1], strides = [1, 1]} : vector<64x2xf32> to vector<64x1xf32>
    %4 = vector.extract_strided_slice %1 {offsets = [0, 0], sizes = [1, 128], strides = [1, 1]} : vector<2x128xf32> to vector<1x128xf32>
    %5 = vector.broadcast %3 : vector<64x1xf32> to vector<64x128xf32>
    %6 = vector.broadcast %4 : vector<1x128xf32> to vector<64x128xf32>
    %7 = arith.mulf %5, %6 : vector<64x128xf32>
    %8 = vector.extract_strided_slice %2 {offsets = [0, 1], sizes = [64, 1], strides = [1, 1]} : vector<64x2xf32> to vector<64x1xf32>
    %9 = vector.extract_strided_slice %1 {offsets = [1, 0], sizes = [1, 128], strides = [1, 1]} : vector<2x128xf32> to vector<1x128xf32>
    %10 = vector.broadcast %8 : vector<64x1xf32> to vector<64x128xf32>
    %11 = vector.broadcast %9 : vector<1x128xf32> to vector<64x128xf32>
    %12 = arith.mulf %10, %11 : vector<64x128xf32>
    %13 = arith.addf %7, %12 : vector<64x128xf32>
    %c0_4 = arith.constant 0 : index
    %c0_5 = arith.constant 0 : index
    %c0_6 = arith.constant 0 : index
    %14 = vector.load %arg3[%c0_4, %c0_5, %c0_6] : memref<1x64x1xf32, #tpu.memory_space<vmem>>, vector<1x64x1xf32>
    %15 = vector.shape_cast %14 : vector<1x64x1xf32> to vector<64x1xf32>
    %16 = vector.broadcast %15 : vector<64x1xf32> to vector<64x128xf32>
    %17 = arith.addf %13, %16 : vector<64x128xf32>
    %cst = arith.constant 1.000000e-01 : f32
    %18 = vector.broadcast %cst : f32 to vector<64x128xf32>
    %19 = arith.mulf %18, %17 : vector<64x128xf32>
    %20 = arith.maximumf %17, %19 : vector<64x128xf32>
    %c0_7 = arith.constant 0 : index
    %c0_8 = arith.constant 0 : index
    %21 = vector.load %arg6[%c0_7, %c0_8] : memref<64x64xf32, #tpu.memory_space<vmem>>, vector<64x64xf32>
    %c0_9 = arith.constant 0 : index
    %c0_10 = arith.constant 0 : index
    %22 = vector.load %arg7[%c0_9, %c0_10] : memref<64x1xf32, #tpu.memory_space<vmem>>, vector<64x1xf32>
    %cst_11 = arith.constant dense<0.000000e+00> : vector<64x128xf32>
    %23 = tpu.matmul %21, %20, %cst_11 {dimension_numbers = #tpu.dot_dimension_numbers<[1], [0], [0], [1], [0, 0, 1, 1], [], []>} : vector<64x64xf32>, vector<64x128xf32>, vector<64x128xf32> -> vector<64x128xf32>
    %24 = vector.broadcast %22 : vector<64x1xf32> to vector<64x128xf32>
    %25 = arith.addf %23, %24 : vector<64x128xf32>
    %cst_12 = arith.constant 1.000000e-01 : f32
    %26 = vector.broadcast %cst_12 : f32 to vector<64x128xf32>
    %27 = arith.mulf %26, %25 : vector<64x128xf32>
    %28 = arith.maximumf %25, %27 : vector<64x128xf32>
    %c0_13 = arith.constant 0 : index
    %c0_14 = arith.constant 0 : index
    %29 = vector.load %arg8[%c0_13, %c0_14] : memref<64x64xf32, #tpu.memory_space<vmem>>, vector<64x64xf32>
    %c0_15 = arith.constant 0 : index
    %c0_16 = arith.constant 0 : index
    %30 = vector.load %arg9[%c0_15, %c0_16] : memref<64x2xf32, #tpu.memory_space<vmem>>, vector<64x2xf32>
    %cst_17 = arith.constant dense<0.000000e+00> : vector<64x128xf32>
    %31 = tpu.matmul %29, %28, %cst_17 {dimension_numbers = #tpu.dot_dimension_numbers<[1], [0], [0], [1], [0, 0, 1, 1], [], []>} : vector<64x64xf32>, vector<64x128xf32>, vector<64x128xf32> -> vector<64x128xf32>
    %32 = vector.extract_strided_slice %30 {offsets = [0, 0], sizes = [64, 1], strides = [1, 1]} : vector<64x2xf32> to vector<64x1xf32>
    %33 = vector.extract_strided_slice %1 {offsets = [0, 0], sizes = [1, 128], strides = [1, 1]} : vector<2x128xf32> to vector<1x128xf32>
    %34 = vector.broadcast %32 : vector<64x1xf32> to vector<64x128xf32>
    %35 = vector.broadcast %33 : vector<1x128xf32> to vector<64x128xf32>
    %36 = arith.mulf %34, %35 : vector<64x128xf32>
    %37 = vector.extract_strided_slice %30 {offsets = [0, 1], sizes = [64, 1], strides = [1, 1]} : vector<64x2xf32> to vector<64x1xf32>
    %38 = vector.extract_strided_slice %1 {offsets = [1, 0], sizes = [1, 128], strides = [1, 1]} : vector<2x128xf32> to vector<1x128xf32>
    %39 = vector.broadcast %37 : vector<64x1xf32> to vector<64x128xf32>
    %40 = vector.broadcast %38 : vector<1x128xf32> to vector<64x128xf32>
    %41 = arith.mulf %39, %40 : vector<64x128xf32>
    %42 = arith.addf %36, %41 : vector<64x128xf32>
    %43 = arith.addf %31, %42 : vector<64x128xf32>
    %c0_18 = arith.constant 0 : index
    %c0_19 = arith.constant 0 : index
    %c0_20 = arith.constant 0 : index
    %44 = vector.load %arg4[%c0_18, %c0_19, %c0_20] : memref<1x64x1xf32, #tpu.memory_space<vmem>>, vector<1x64x1xf32>
    %45 = vector.shape_cast %44 : vector<1x64x1xf32> to vector<64x1xf32>
    %46 = vector.broadcast %45 : vector<64x1xf32> to vector<64x128xf32>
    %47 = arith.addf %43, %46 : vector<64x128xf32>
    %cst_21 = arith.constant 1.000000e-01 : f32
    %48 = vector.broadcast %cst_21 : f32 to vector<64x128xf32>
    %49 = arith.mulf %48, %47 : vector<64x128xf32>
    %50 = arith.maximumf %47, %49 : vector<64x128xf32>
    %c0_22 = arith.constant 0 : index
    %c0_23 = arith.constant 0 : index
    %51 = vector.load %arg10[%c0_22, %c0_23] : memref<64x64xf32, #tpu.memory_space<vmem>>, vector<64x64xf32>
    %c0_24 = arith.constant 0 : index
    %c0_25 = arith.constant 0 : index
    %52 = vector.load %arg11[%c0_24, %c0_25] : memref<64x1xf32, #tpu.memory_space<vmem>>, vector<64x1xf32>
    %cst_26 = arith.constant dense<0.000000e+00> : vector<64x128xf32>
    %53 = tpu.matmul %51, %50, %cst_26 {dimension_numbers = #tpu.dot_dimension_numbers<[1], [0], [0], [1], [0, 0, 1, 1], [], []>} : vector<64x64xf32>, vector<64x128xf32>, vector<64x128xf32> -> vector<64x128xf32>
    %54 = vector.broadcast %52 : vector<64x1xf32> to vector<64x128xf32>
    %55 = arith.addf %53, %54 : vector<64x128xf32>
    %cst_27 = arith.constant 1.000000e-01 : f32
    %56 = vector.broadcast %cst_27 : f32 to vector<64x128xf32>
    %57 = arith.mulf %56, %55 : vector<64x128xf32>
    %58 = arith.maximumf %55, %57 : vector<64x128xf32>
    %c0_28 = arith.constant 0 : index
    %c0_29 = arith.constant 0 : index
    %59 = vector.load %arg12[%c0_28, %c0_29] : memref<1x64xf32, #tpu.memory_space<vmem>>, vector<1x64xf32>
    %c0_30 = arith.constant 0 : index
    %c0_31 = arith.constant 0 : index
    %60 = vector.load %arg13[%c0_30, %c0_31] : memref<1x1xf32, #tpu.memory_space<vmem>>, vector<1x1xf32>
    %cst_32 = arith.constant dense<0.000000e+00> : vector<1x128xf32>
    %61 = tpu.matmul %59, %58, %cst_32 {dimension_numbers = #tpu.dot_dimension_numbers<[1], [0], [0], [1], [0, 0, 1, 1], [], []>} : vector<1x64xf32>, vector<64x128xf32>, vector<1x128xf32> -> vector<1x128xf32>
    %62 = vector.broadcast %60 : vector<1x1xf32> to vector<1x128xf32>
    %63 = arith.addf %61, %62 : vector<1x128xf32>
    %64 = vector.shape_cast %63 : vector<1x128xf32> to vector<1x1x128xf32>
    %c0_33 = arith.constant 0 : index
    %c0_34 = arith.constant 0 : index
    %c0_35 = arith.constant 0 : index
    %65 = vector.load %arg14[%c0_33, %c0_34, %c0_35] : memref<1x1x128xf32, #tpu.memory_space<vmem>>, vector<1x1x128xf32>
    tpu.vector_store %arg14[%c0_33, %c0_34, %c0_35], %64 {strides = array<i32>} : memref<1x1x128xf32, #tpu.memory_space<vmem>>, vector<1x1x128xf32>,
    return
  }
  func.func @transform_0(%arg0: i32, %arg1: i32) -> (i32, i32, i32) {
    %c0_i32 = arith.constant 0 : i32
    %c0_i32_0 = arith.constant 0 : i32
    return %arg0, %c0_i32, %arg1 : i32, i32, i32
  }
  func.func @transform_1(%arg0: i32, %arg1: i32) -> (i32, i32, i32) {
    %c0_i32 = arith.constant 0 : i32
    %c0_i32_0 = arith.constant 0 : i32
    %c0_i32_1 = arith.constant 0 : i32
    return %arg0, %c0_i32, %c0_i32_0 : i32, i32, i32
  }
  func.func @transform_2(%arg0: i32, %arg1: i32) -> (i32, i32, i32) {
    %c0_i32 = arith.constant 0 : i32
    %c0_i32_0 = arith.constant 0 : i32
    %c0_i32_1 = arith.constant 0 : i32
    return %arg0, %c0_i32, %c0_i32_0 : i32, i32, i32
  }
  func.func @transform_3(%arg0: i32, %arg1: i32) -> (i32, i32) {
    %c0_i32 = arith.constant 0 : i32
    %c0_i32_0 = arith.constant 0 : i32
    %c0_i32_1 = arith.constant 0 : i32
    return %c0_i32, %c0_i32_0 : i32, i32
  }
  func.func @transform_4(%arg0: i32, %arg1: i32) -> (i32, i32) {
    %c0_i32 = arith.constant 0 : i32
    %c0_i32_0 = arith.constant 0 : i32
    %c0_i32_1 = arith.constant 0 : i32
    return %c0_i32, %c0_i32_0 : i32, i32
  }
  func.func @transform_5(%arg0: i32, %arg1: i32) -> (i32, i32) {
    %c0_i32 = arith.constant 0 : i32
    %c0_i32_0 = arith.constant 0 : i32
    %c0_i32_1 = arith.constant 0 : i32
    return %c0_i32, %c0_i32_0 : i32, i32
  }
  func.func @transform_6(%arg0: i32, %arg1: i32) -> (i32, i32) {
    %c0_i32 = arith.constant 0 : i32
    %c0_i32_0 = arith.constant 0 : i32
    %c0_i32_1 = arith.constant 0 : i32
    return %c0_i32, %c0_i32_0 : i32, i32
  }
  func.func @transform_7(%arg0: i32, %arg1: i32) -> (i32, i32) {
    %c0_i32 = arith.constant 0 : i32
    %c0_i32_0 = arith.constant 0 : i32
    %c0_i32_1 = arith.constant 0 : i32
    return %c0_i32, %c0_i32_0 : i32, i32
  }
  func.func @transform_8(%arg0: i32, %arg1: i32) -> (i32, i32) {
    %c0_i32 = arith.constant 0 : i32
    %c0_i32_0 = arith.constant 0 : i32
    %c0_i32_1 = arith.constant 0 : i32
    return %c0_i32, %c0_i32_0 : i32, i32
  }
  func.func @transform_9(%arg0: i32, %arg1: i32) -> (i32, i32) {
    %c0_i32 = arith.constant 0 : i32
    %c0_i32_0 = arith.constant 0 : i32
    %c0_i32_1 = arith.constant 0 : i32
    return %c0_i32, %c0_i32_0 : i32, i32
  }
  func.func @transform_10(%arg0: i32, %arg1: i32) -> (i32, i32) {
    %c0_i32 = arith.constant 0 : i32
    %c0_i32_0 = arith.constant 0 : i32
    %c0_i32_1 = arith.constant 0 : i32
    return %c0_i32, %c0_i32_0 : i32, i32
  }
  func.func @transform_11(%arg0: i32, %arg1: i32) -> (i32, i32) {
    %c0_i32 = arith.constant 0 : i32
    %c0_i32_0 = arith.constant 0 : i32
    %c0_i32_1 = arith.constant 0 : i32
    return %c0_i32, %c0_i32_0 : i32, i32
  }
  func.func @transform_12(%arg0: i32, %arg1: i32) -> (i32, i32, i32) {
    %c0_i32 = arith.constant 0 : i32
    %c0_i32_0 = arith.constant 0 : i32
    return %arg0, %c0_i32, %arg1 : i32, i32, i32
  }
}

</mosaic_0001>

<bundles_post_ra>
// kernel: tpu_custom_call.1
= control target key start
LH: loop header
LB: loop body
LE: loop exit
PB: predicated region body
PF: predicated region fallthrough
CT: control target
= control target key end

     0   :  { %s2466_s0 = inlined_call_operand.vmem [shape: f32[2,2,128], index: 0, kind: input, shape index: {}]   ;;  %s2467_s1 = inlined_call_operand.vmem [shape: f32[2,64,1], index: 1, kind: input, shape index: {}]   ;;  %s2468_s2 = inlined_call_operand.vmem [shape: f32[2,64,1], index: 2, kind: input, shape index: {}]   ;;  %s2469_s3 = inlined_call_operand.vmem [shape: f32[64,2], index: 3, kind: input, shape index: {}]   ;;  %s2470_s4 = inlined_call_operand.vmem [shape: f32[64,64], index: 4, kind: input, shape index: {}]   ;;  %s2471_s5 = inlined_call_operand.vmem [shape: f32[64,1], index: 5, kind: input, shape index: {}]   ;;  %s2472_s6 = inlined_call_operand.vmem [shape: f32[64,64], index: 6, kind: input, shape index: {}]   ;;  %s2473_s7 = inlined_call_operand.vmem [shape: f32[64,2], index: 7, kind: input, shape index: {}]   ;;  %s2474_s8 = inlined_call_operand.vmem [shape: f32[64,64], index: 8, kind: input, shape index: {}]   ;;  %s2475_s9 = inlined_call_operand.vmem [shape: f32[64,1], index: 9, kind: input, shape index: {}]   ;;  %s2476_s10 = inlined_call_operand.vmem [shape: f32[1,64], index: 10, kind: input, shape index: {}]   ;;  %s2477_s11 = inlined_call_operand.<no memory space> [shape: f32[1,1], index: 11, kind: input, shape index: {}]   ;;  %s2478_s12 = inlined_call_operand.hbm [shape: f32[2,1,128], index: 12, kind: output, shape index: {}]  }
   0x1   :  { %2480 = sst [smem:[#allocation6_spill]] %s2466_s0  ;;  %v17_v0 = vstv %s2477_s11 }
   0x2   :  { %2481 = sst [smem:[#allocation7_spill]] %s2467_s1  ;;  %18 = vst [vmem:[#allocation2] sm:$0x1] %v17_v0 }
   0x3   :  { %19 = vsyncpa [#allocation4], 0 }
   0x4   :  { %21 = vsyncpa [#allocation4 + $0x1], 0  ;;  %s2060_s23 = smov 0   ;;  %s2062_s24 = smov 0  }
   0x5   :  { %s2064_s25 = smov 0   ;;  %s2066_s26 = smov 0  }
   0x6   :  { %s2068_s27 = smov 0   ;;  %s2070_s28 = smov 0  }
   0x7 LB: > { %s1566_s11 = sadd.s32 4294967295, %s1984_s28   ;;  %s1567_s29 = sadd.s32 4294967294, %s1984_s28   ;;  %s1984_s28 = sphi %s2070_s28, %s27_s28   ;;  %s1980_s27 = sphi %s2068_s27, %s2491_s27   ;;  %s1976_s26 = sphi %s2066_s26, %s2490_s26   ;;  %s1972_s25 = sphi %s2064_s25, %s2489_s25   ;;  %s1968_s24 = sphi %s2062_s24, %s2488_s24   ;;  %s1964_s23 = sphi %s2060_s23, %s2487_s23  }
   0x8   : > { %s39_s30 = sadd.s32 1, %s1980_s27  ;;  %s317_s13 = sadd.s32 1, %s1972_s25 }
   0x9   : > { %p41_p0 = scmp.ge.s32.totalorder %s39_s30, 2  ;;  %p327_p1 = scmp.ne.s32.totalorder %s1972_s25, %s1968_s24 }
   0xa   : > { %p328_p2 = scmp.eq.s32.totalorder %s1566_s11, 1  ;;  %p333_p3 = scmp.ne.s32.totalorder %s1968_s24, %s1964_s23 }
   0xb   : > { %s2493_s30 = smov (%p41_p0, %s39_s30), 0  ;;  %p334_p5 = scmp.eq.s32.totalorder %s1567_s29, 1 }
   0xc   : > { %p2100_p4 = por %p328_p2, %p327_p1  ;;  %s312_s15 = ssub.s32 %s1980_s27, %s2493_s30 }
   0xd   : > { %p1570_p6 = scmp.ge.s32.totalorder %s1984_s28, 1  ;;  %p315_p7 = scmp.eq.s32.totalorder %s312_s15, 0 }
   0xe   : > { %p2107_p8 = por %p334_p5, %p333_p3  ;;  %p405_p9 = scmp.lt.s32.totalorder %s1984_s28, 3 }
   0xf   : > { %s2113_s17 = scalar_select %p315_p7, %s1972_s25, %s317_s13  }
  0x10   : > { %p406_p10 = pnand %p1570_p6, %p405_p9 }
  0x11   : > { %v478_v1 = vld [vmem:[%s2469_s3 + $0x10] sm:$0xff] (!%p406_p10)  ;;  %v476_v2 = vld [vmem:[%s2469_s3] sm:$0xff] (!%p406_p10)  ;;  %v1986_v3 = vmov (!%p406_p10), 1   ;;  %v477_v5 = vld [vmem:[%s2469_s3 + $0x8] sm:$0xff] (!%p406_p10)  ;;  %p458_p11 = scmp.lt.s32.totalorder (!%p406_p10), %s1976_s26, 1  ;;  %v1987_v8 = vmov (!%p406_p10), 0   ;;  %v524_v31 = vlaneseq (!%p406_p10) }
  0x12   : > { %409 = sbr.rel (%p406_p10) target bundleno = 1162 (0x48a), region = 68  ;;  %1888 = vset.pattern.permute.xlu0 (!%p406_p10), %v1986_v3  ;;  %1886 = vset.pattern.permute.xlu1 (!%p406_p10), %v1986_v3  ;;  %v480_v4 = vld [vmem:[%s2469_s3 + $0x20] sm:$0xff] (!%p406_p10)  ;;  %v482_v6 = vld [vmem:[%s2469_s3 + $0x30] sm:$0xff] (!%p406_p10)  ;;  %v479_v7 = vld [vmem:[%s2469_s3 + $0x18] sm:$0xff] (!%p406_p10)  ;;  %s2484_s1 = sld [smem:[#allocation7_spill]] (!%p406_p10)  ;;  %vm716_vm0 = vcmask (!%p406_p10), 523264  }
  0x13   : > { %545 = vperm.xlu0 (!%p406_p10), %1888, %v478_v1   ;;  %537 = vperm.xlu1 (!%p406_p10), %1886, %v476_v2   ;;  %v481_v11 = vld [vmem:[%s2469_s3 + $0x28] sm:$0xff] (!%p406_p10)  ;;  %v668_v14 = vld [vmem:[%s2471_s5] sm:$0xff] (!%p406_p10)  ;;  %v670_v16 = vld [vmem:[%s2471_s5 + $0x10] sm:$0xff] (!%p406_p10)  ;;  %v2204_v34 = vshrl.u32 (!%p406_p10), %v524_v31, 7  ;;  %s2485_s0 = sld [smem:[#allocation6_spill]] (!%p406_p10)  ;;  %vm1989_vm1 = vmmov (!%p406_p10), 0  }
  0x14   : > { %v672_v17 = vld [vmem:[%s2471_s5 + $0x20] sm:$0xff] (!%p406_p10)  ;;  %v483_v18 = vld [vmem:[%s2469_s3 + $0x38] sm:$0xff] (!%p406_p10)  ;;  %v674_v19 = vld [vmem:[%s2471_s5 + $0x30] sm:$0xff] (!%p406_p10)  ;;  %s1991_s18 = smov (!%p406_p10), [#allocation3]  }
  0x15   : > { %v669_v23 = vld [vmem:[%s2471_s5 + $0x8] sm:$0xff] (!%p406_p10)  ;;  %v671_v24 = vld [vmem:[%s2471_s5 + $0x18] sm:$0xff] (!%p406_p10)  ;;  %v660_v26 = vld [vmem:[%s2470_s4] sm:$0xff] (!%p406_p10)  ;;  %v526_v37 = vsub.s32 (!%p406_p10), 0, %v2204_v34  ;;  %v570_v38 = vsub.s32 (!%p406_p10), 1, %v2204_v34 }
  0x16   : > { %v673_v25 = vld [vmem:[%s2471_s5 + $0x28] sm:$0xff] (!%p406_p10)  ;;  %1679 = vmatprep.mubr.msk.f32.mxu0 (!%p406_p10), %vm716_vm0, %v660_v26  ;;  %v675_v27 = vld [vmem:[%s2471_s5 + $0x38] sm:$0xff] (!%p406_p10) }
  0x17   : > { %553 = vperm.xlu0 (!%p406_p10), %1888, %v480_v4   ;;  %541 = vperm.xlu1 (!%p406_p10), %1886, %v477_v5   ;;  %v871_v28 = vld [vmem:[%s2473_s7 + $0x8] sm:$0xff] (!%p406_p10) }
  0x19   : > { %s2137_s21 = scalar_select %p458_p11, %s1976_s26, 1 }
  0x1b   : > { %561 = vperm.xlu0 %1888, %v482_v6   ;;  %1887 = vset.pattern.permute.xlu1 %v1987_v8  ;;  %s2479_s22 = sshll.u32 %s2137_s21, 6 }
  0x1c   : > { %501 = vperm.xlu1 %1887, %v479_v7   ;;  %s2148_s13 = scalar_lea.vmem %s2484_s1, %s2479_s22  ;;  %s1571_s22 = sshll.u32 %s2137_s21, 1 }
  0x1d   : > { %v588_v9 = vld [vmem:[%s2148_s13] sm:$0xff]  ;;  %v589_v10 = vld [vmem:[%s2148_s13 + $0x8] sm:$0xff]  ;;  %v591_v12 = vld [vmem:[%s2148_s13 + $0x18] sm:$0xff]  ;;  %s464_s19 = scalar_lea.vmem %s2485_s0, %s1571_s22 }
  0x1e   : > { %v593_v13 = vld [vmem:[%s2148_s13 + $0x28] sm:$0xff]  ;;  %v590_v15 = vld [vmem:[%s2148_s13 + $0x10] sm:$0xff]  ;;  %v592_v20 = vld [vmem:[%s2148_s13 + $0x20] sm:$0xff] }
  0x1f   : > { %1893 = vset.pattern.permute.xlu0 %v1987_v8  ;;  %v594_v21 = vld [vmem:[%s2148_s13 + $0x30] sm:$0xff]  ;;  %v595_v22 = vld [vmem:[%s2148_s13 + $0x38] sm:$0xff]  ;;  %v475_v39 = vld [vmem:[%s464_s19] sm:$0x3]  ;;  %s2486_s19 = sshll.u32 %s2137_s21, 6  ;;  %s456_s13 = sand.u32 1, %s1968_s24  }
  0x20   : > { %486 = vperm.xlu0 %1893, %v476_v2   ;;  %1889 = vset.pattern.permute.xlu1 %v1986_v3  ;;  %v2213_v41 = vrot.slane %v475_v39, %v526_v37  ;;  %v2215_v42 = vrot.slane %v475_v39, %v570_v38  ;;  %s2286_s0 = scalar_lea.vmem %s2468_s2, %s2486_s19  ;;  %s457_s11 = scalar_lea.vmem [#allocation3], %s456_s13 }
  0x21   : > { %549 = vperm.xlu1 %1889, %v479_v7   ;;  %s1475_s21 = sshll.u32 %s457_s11, 4  ;;  %s1910_s19 = sshll.u32 %s1991_s18, 4  ;;  %s2421_s21 = int_to_ptr.vmem [resolvable:$true] %s1475_s21  ;;  %s1911_s19 = int_to_ptr.vmem [resolvable:$false] %s1910_s19 }
  0x22   : > { %s1906_s15 = scalar_lea.vmem %s2421_s21, 16  ;;  %s1912_s20 = scalar_lea.vmem %s1911_s19, 32 }
  0x23   : > { %p1907_p12 = scmp.ne.s32.totalorder %s2421_s21, %s1906_s15  ;;  %p1913_p1 = scmp.lt.s32.totalorder %s2421_s21, %s1911_s19 }
  0x24   : > { %491 = vperm.xlu0 %1893, %v477_v5   ;;  %p1914_p2 = scmp.lt.s32.totalorder %s1912_s20, %s1906_s15 }
  0x25   : > { %1890 = vset.pattern.permute.xlu1 %v1987_v8  ;;  %p1908_p13 = pnand %p1907_p12, %p2100_p4 }
  0x26   : > { %598 = vperm.xlu1 %1890, %v588_v9   ;;  %p1915_p3 = por %p1914_p2, %p1913_p1 }
  0x27   : > { %p1909_p0 = pneg %p1908_p13 }
  0x28   : > { %496 = vperm.xlu0 %1893, %v478_v1  }
  0x29   : > { %p1916_p5 = pnand %p1915_p3, %p1909_p0 }
  0x2a   : > { %506 = vperm.xlu1 %1890, %v480_v4  }
  0x2c   : > { %603 = vperm.xlu0 %1893, %v589_v10  }
  0x2e   : > { %511 = vperm.xlu1 %1890, %v481_v11  }
  0x30   : > { %613 = vperm.xlu0 %1893, %v591_v12  }
  0x32   : > { %1891 = vset.pattern.permute.xlu1 %v1986_v3 }
  0x33   : > { %557 = vperm.xlu1 %1891, %v481_v11  }
  0x34   : > { %623 = vperm.xlu0 %1893, %v593_v13  }
  0x37   : > { %1892 = vset.pattern.permute.xlu1 %v1987_v8 }
  0x38   : > { %678 = vperm.xlu0 %1893, %v668_v14   ;;  %608 = vperm.xlu1 %1892, %v590_v15  }
  0x3c   : > { %688 = vperm.xlu0 %1893, %v670_v16   ;;  %516 = vperm.xlu1 %1892, %v482_v6  }
  0x40   : > { %698 = vperm.xlu0 %1893, %v672_v17   ;;  %521 = vperm.xlu1 %1892, %v483_v18  }
  0x44   : > { %708 = vperm.xlu0 %1893, %v674_v19   ;;  %1894 = vset.pattern.permute.xlu1 %v1986_v3 }
  0x45   : > { %565 = vperm.xlu1 %1894, %v483_v18  }
  0x48   : > { %1896 = vset.pattern.permute.xlu0 %v1986_v3 }
  0x49   : > { %1895 = vset.pattern.permute.xlu1 %v1987_v8 }
  0x4a   : > { %618 = vperm.xlu1 %1895, %v592_v20  }
  0x4e   : > { %628 = vperm.xlu1 %1895, %v594_v21  }
  0x52   : > { %633 = vperm.xlu1 %1895, %v595_v22  }
  0x56   : > { %683 = vperm.xlu1 %1895, %v669_v23  }
  0x5a   : > { %693 = vperm.xlu1 %1895, %v671_v24  }
  0x5e   : > { %703 = vperm.xlu1 %1895, %v673_v25  }
  0x62   : > { %713 = vperm.xlu1 %1895, %v675_v27  }
  0x66   : > { %885 = vperm.xlu1 %1895, %v871_v28  }
  0x6a   : > { %1897 = vset.pattern.permute.xlu1 %v1986_v3 }
  0x6b   : > { %931 = vperm.xlu1 %1897, %v871_v28  }
  0x6f   : > { %1898 = vset.pattern.permute.xlu1 %v1987_v8 }
  0x92   : > { %v538_v29 = vpop.permute.xlu1 %537  ;;  %v546_v30 = vpop.permute.xlu0 %545 }
  0x93   : > { %v572_v46 = vmul.f32 %v2215_v42, %v538_v29  ;;  %v574_v1 = vmul.f32 %v2215_v42, %v546_v30 }
  0x96   : > { %v542_v32 = vpop.permute.xlu1 %541  ;;  %v554_v33 = vpop.permute.xlu0 %553 }
  0x97   : > { %v573_v51 = vmul.f32 %v2215_v42, %v542_v32  ;;  %v576_v22 = vmul.f32 %v2215_v42, %v554_v33 }
  0x9a   : > { %v562_v35 = vpop.permute.xlu0 %561 }
  0x9b   : > { %v502_v36 = vpop.permute.xlu1 %501  ;;  %v578_v30 = vmul.f32 %v2215_v42, %v562_v35 }
  0x9c   : > { %v531_v61 = vmul.f32 %v2213_v41, %v502_v36 }
  0x9f   : > { %v487_v40 = vpop.permute.xlu0 %486 }
  0xa0   : > { %v550_v43 = vpop.permute.xlu1 %549  ;;  %v528_v44 = vmul.f32 %v2213_v41, %v487_v40 }
  0xa1   : > { %v575_v59 = vmul.f32 %v2215_v42, %v550_v43 }
  0xa2   : > { %v580_v49 = vadd.f32 %v572_v46, %v528_v44 }
  0xa3   : > { %v492_v45 = vpop.permute.xlu0 %491  ;;  %v583_v4 = vadd.f32 %v575_v59, %v531_v61  ;;  %v666_v59 = vld [vmem:[%s2470_s4 + $0x30] sm:$0xff]  ;;  %v862_v61 = vld [vmem:[%s2472_s6] sm:$0xff] }
  0xa4   : > { %v529_v48 = vmul.f32 %v2213_v41, %v492_v45  ;;  %1707 = vmatprep.mubr.msk.f32.mxu1 %vm716_vm0, %v862_v61 }
  0xa5   : > { %v599_v47 = vpop.permute.xlu1 %598 }
  0xa6   : > { %v636_v52 = vadd.f32 %v599_v47, %v580_v49  ;;  %v581_v54 = vadd.f32 %v573_v51, %v529_v48 }
  0xa7   : > { %v497_v50 = vpop.permute.xlu0 %496 }
  0xa8   : > { %v644_v56 = vmul.f32 0.1, %v636_v52  ;;  %v530_v2 = vmul.f32 %v2213_v41, %v497_v50 }
  0xa9   : > { %v507_v53 = vpop.permute.xlu1 %506 }
  0xaa   : > { %v652_v62 = vmax.f32 %v636_v52, %v644_v56  ;;  %v582_v9 = vadd.f32 %v574_v1, %v530_v2  ;;  %v532_v23 = vmul.f32 %v2213_v41, %v507_v53  ;;  %v663_v56 = vld [vmem:[%s2470_s4 + $0x18] sm:$0xff]  ;;  %v876_v1 = vld [vmem:[%s2473_s7 + $0x30] sm:$0xff] }
  0xab   : > { %v604_v55 = vpop.permute.xlu0 %603  ;;  %v873_v2 = vld [vmem:[%s2473_s7 + $0x18] sm:$0xff] }
  0xac   : > { %v637_v57 = vadd.f32 %v604_v55, %v581_v54  ;;  %v584_v28 = vadd.f32 %v576_v22, %v532_v23  ;;  %v661_v54 = vld [vmem:[%s2470_s4 + $0x8] sm:$0xff]  ;;  %v662_v55 = vld [vmem:[%s2470_s4 + $0x10] sm:$0xff] }
  0xad   : > { %v512_v58 = vpop.permute.xlu1 %511 }
  0xae   : > { %v645_v60 = vmul.f32 0.1, %v637_v57  ;;  %v533_v20 = vmul.f32 %v2213_v41, %v512_v58  ;;  %v665_v58 = vld [vmem:[%s2470_s4 + $0x28] sm:$0xff] }
  0xaf   : > { %v614_v0 = vpop.permute.xlu0 %613 }
  0xb0   : > { %v653_v63 = vmax.f32 %v637_v57, %v645_v60  ;;  %v639_v7 = vadd.f32 %v614_v0, %v583_v4  ;;  %v664_v57 = vld [vmem:[%s2470_s4 + $0x20] sm:$0xff]  ;;  %v667_v60 = vld [vmem:[%s2470_s4 + $0x38] sm:$0xff]  ;;  %v1104_v4 = vld [vmem:[%s2286_s0 + $0x8] sm:$0xff] }
  0xb1   : > { %v874_v0 = vld [vmem:[%s2473_s7 + $0x20] sm:$0xff] }
  0xb2   : > { %v558_v5 = vpop.permute.xlu1 %557  ;;  %v1766_v6 = vpack.c.bf16 %v653_v63, %v652_v62  ;;  %v647_v11 = vmul.f32 0.1, %v639_v7  ;;  %v872_v62 = vld [vmem:[%s2473_s7 + $0x10] sm:$0xff]  ;;  %v870_v63 = vld [vmem:[%s2473_s7] sm:$0xff] }
  0xb3   : > { %v577_v17 = vmul.f32 %v2215_v42, %v558_v5  ;;  %v624_v25 = vpop.permute.xlu0 %623  ;;  %890 = vperm.xlu1 %1898, %v872_v62   ;;  %927 = vperm.xlu0 %1896, %v870_v63   ;;  %v875_v5 = vld [vmem:[%s2473_s7 + $0x28] sm:$0xff] }
  0xb4   : > { %1767 = vmatprep.subr.bf16.mxu0 %v1766_v6  ;;  %v655_v15 = vmax.f32 %v639_v7, %v647_v11  ;;  %v1105_v7 = vld [vmem:[%s2286_s0 + $0x10] sm:$0xff]  ;;  %v877_v11 = vld [vmem:[%s2473_s7 + $0x38] sm:$0xff] }
  0xb5   : > { %1769 = vmatpush3.bf16.msra.mxu0 %v1766_v6  ;;  %v585_v21 = vadd.f32 %v577_v17, %v533_v20  ;;  %v1103_v6 = vld [vmem:[%s2286_s0] sm:$0xff]  ;;  %v1109_v17 = vld [vmem:[%s2286_s0 + $0x30] sm:$0xff]  ;;  %v1188_v20 = vld [vmem:[%s2475_s9 + $0x28] sm:$0xff] }
  0xb7   : > { %v609_v10 = vpop.permute.xlu1 %608  ;;  %v641_v26 = vadd.f32 %v624_v25, %v585_v21  ;;  %1899 = vset.pattern.permute.xlu1 %v1986_v3  ;;  %943 = vperm.xlu0 %1896, %v874_v0   ;;  %v1190_v21 = vld [vmem:[%s2475_s9 + $0x38] sm:$0xff]  ;;  %v679_v23 = vpop.permute.xlu0 %678 }
  0xb8   : > { %v638_v12 = vadd.f32 %v609_v10, %v582_v9  ;;  %935 = vperm.xlu1 %1899, %v872_v62   ;;  %v1106_v9 = vld [vmem:[%s2286_s0 + $0x18] sm:$0xff]  ;;  %v1108_v10 = vld [vmem:[%s2286_s0 + $0x28] sm:$0xff] }
  0xb9   : > { %v649_v31 = vmul.f32 0.1, %v641_v26 }
  0xba   : > { %v646_v13 = vmul.f32 0.1, %v638_v12 }
  0xbb   : > { %v517_v14 = vpop.permute.xlu1 %516  ;;  %v657_v43 = vmax.f32 %v641_v26, %v649_v31  ;;  %951 = vperm.xlu0 %1896, %v876_v1   ;;  %v689_v26 = vpop.permute.xlu0 %688 }
  0xbc   : > { %v654_v16 = vmax.f32 %v638_v12, %v646_v13  ;;  %v534_v27 = vmul.f32 %v2213_v41, %v517_v14  ;;  %939 = vperm.xlu1 %1899, %v873_v2   ;;  %v1183_v12 = vld [vmem:[%s2475_s9] sm:$0xff]  ;;  %v1185_v13 = vld [vmem:[%s2475_s9 + $0x10] sm:$0xff] }
  0xbd   : > { %v1187_v14 = vld [vmem:[%s2475_s9 + $0x20] sm:$0xff] }
  0xbe   : > { %v1770_v18 = vpack.c.bf16 %v655_v15, %v654_v16  ;;  %v586_v39 = vadd.f32 %v578_v30, %v534_v27  ;;  %v1107_v15 = vld [vmem:[%s2286_s0 + $0x20] sm:$0xff]  ;;  %v1189_v16 = vld [vmem:[%s2475_s9 + $0x30] sm:$0xff] }
  0xbf   : > { %v522_v19 = vpop.permute.xlu1 %521  ;;  %1903 = vset.pattern.permute.xlu0 %v1987_v8 }
  0xc0   : > { %1771 = vmatprep.subr.bf16.mxu0 %v1770_v18  ;;  %v535_v33 = vmul.f32 %v2213_v41, %v522_v19  ;;  %1900 = vset.pattern.permute.xlu1 %v1987_v8  ;;  %v1184_v19 = vld [vmem:[%s2475_s9 + $0x8] sm:$0xff] }
  0xc1   : > { %1773 = vmatpush3.bf16.msra.mxu0 %v1770_v18  ;;  %880 = vperm.xlu0 %1903, %v870_v63   ;;  %v1377_v18 = vld [vmem:[#allocation2] sm:$0x1] }
  0xc2   : > { %1118 = vperm.xlu1 %1900, %v1104_v4  }
  0xc4   : > { %v566_v24 = vpop.permute.xlu1 %565 }
  0xc5   : > { %v579_v36 = vmul.f32 %v2215_v42, %v566_v24  ;;  %895 = vperm.xlu0 %1903, %v873_v2  }
  0xc6   : > { %905 = vperm.xlu1 %1900, %v875_v5  }
  0xc7   : > { %v587_v46 = vadd.f32 %v579_v36, %v535_v33 }
  0xc9   : > { %v619_v29 = vpop.permute.xlu1 %618  ;;  %1113 = vperm.xlu0 %1903, %v1103_v6  }
  0xca   : > { %v640_v32 = vadd.f32 %v619_v29, %v584_v28  ;;  %1901 = vset.pattern.permute.xlu1 %v1986_v3 }
  0xcb   : > { %947 = vperm.xlu1 %1901, %v875_v5  }
  0xcc   : > { %v648_v38 = vmul.f32 0.1, %v640_v32 }
  0xcd   : > { %v629_v40 = vpop.permute.xlu1 %628  ;;  %900 = vperm.xlu0 %1903, %v874_v0  }
  0xce   : > { %v656_v44 = vmax.f32 %v640_v32, %v648_v38  ;;  %v642_v45 = vadd.f32 %v629_v40, %v586_v39 }
  0xcf   : > { %1902 = vset.pattern.permute.xlu1 %v1987_v8 }
  0xd0   : > { %v1774_v47 = vpack.c.bf16 %v657_v43, %v656_v44  ;;  %v650_v49 = vmul.f32 0.1, %v642_v45  ;;  %1123 = vperm.xlu1 %1902, %v1105_v7   ;;  %v699_v44 = vpop.permute.xlu0 %698  ;;  %v863_v7 = vld [vmem:[%s2472_s6 + $0x8] sm:$0xff] }
  0xd1   : > { %v634_v48 = vpop.permute.xlu1 %633  ;;  %1128 = vperm.xlu0 %1903, %v1106_v9   ;;  %v864_v9 = vld [vmem:[%s2472_s6 + $0x10] sm:$0xff] }
  0xd2   : > { %v643_v50 = vadd.f32 %v634_v48, %v587_v46  ;;  %1775 = vmatprep.subr.bf16.mxu0 %v1774_v47  ;;  %v658_v51 = vmax.f32 %v642_v45, %v650_v49 }
  0xd3   : > { %1777 = vmatpush3.bf16.msra.mxu0 %v1774_v47 }
  0xd4   : > { %v651_v35 = vmul.f32 0.1, %v643_v50  ;;  %910 = vperm.xlu1 %1902, %v876_v1  }
  0xd5   : > { %1138 = vperm.xlu0 %1903, %v1108_v10   ;;  %v684_v22 = vpop.permute.xlu1 %683  ;;  %v865_v10 = vld [vmem:[%s2472_s6 + $0x18] sm:$0xff] }
  0xd6   : > { %v659_v52 = vmax.f32 %v643_v50, %v651_v35 }
  0xd8   : > { %v1778_v53 = vpack.c.bf16 %v659_v52, %v658_v51  ;;  %915 = vperm.xlu1 %1902, %v877_v11  }
  0xd9   : > { %1193 = vperm.xlu0 %1903, %v1183_v12   ;;  %v694_v24 = vpop.permute.xlu1 %693  ;;  %v867_v12 = vld [vmem:[%s2472_s6 + $0x28] sm:$0xff] }
  0xda   : > { %1779 = vmatprep.subr.bf16.mxu0 %v1778_v53 }
  0xdb   : > { %1781 = vmatpush3.bf16.msra.mxu0 %v1778_v53 }
  0xdc   : > { %1904 = vset.pattern.permute.xlu1 %v1986_v3  ;;  %v1110_v3 = vld [vmem:[%s2286_s0 + $0x38] sm:$0xff]  ;;  %s1601_s0 = sshll.u32 %s1976_s26, 4  ;;  %s1462_s26 = scalar_lea.sflag [#allocation4], %s456_s13 }
  0xdd   : > { %955 = vperm.xlu1 %1904, %v877_v11   ;;  %1203 = vperm.xlu0 %1903, %v1185_v13   ;;  %v704_v40 = vpop.permute.xlu1 %703  ;;  %v866_v11 = vld [vmem:[%s2472_s6 + $0x20] sm:$0xff]  ;;  %v868_v13 = vld [vmem:[%s2472_s6 + $0x30] sm:$0xff]  ;;  %s2419_s22 = scalar_lea.hbm %s2478_s12, %s1601_s0 }
  0xde   : > { %1680 = vmatmul.mubr.msk.f32.vlgmr.msra.gmra.mrb[0].mxu0 %vm716_vm0, %v661_v54 }
  0xdf   : > { %1682 = vmatprep.mubr.msk.f32.mxu0 %vm716_vm0, %v662_v55 }
  0xe1   : > { %1905 = vset.pattern.permute.xlu1 %v1987_v8  ;;  %1213 = vperm.xlu0 %1903, %v1187_v14   ;;  %v1186_v8 = vld [vmem:[%s2475_s9 + $0x18] sm:$0xff]  ;;  %v714_v54 = vpop.permute.xlu1 %713 }
  0xe2   : > { %1683 = vmatmul.mubr.msk.f32.gmra.mrb[2].mxu0 %vm716_vm0, %v663_v56  ;;  %1133 = vperm.xlu1 %1905, %v1107_v15   ;;  %v869_v14 = vld [vmem:[%s2472_s6 + $0x38] sm:$0xff]  ;;  %v1175_v15 = vld [vmem:[%s2474_s8] sm:$0xff] }
  0xe3   : > { %1685 = vmatprep.mubr.msk.f32.mxu0 %vm716_vm0, %v664_v57 }
  0xe5   : > { %1223 = vperm.xlu0 %1903, %v1189_v16   ;;  %v886_v16 = vpop.permute.xlu1 %885 }
  0xe6   : > { %1686 = vmatmul.mubr.msk.f32.gmra.mrb[4].mxu0 %vm716_vm0, %v665_v58  ;;  %1143 = vperm.xlu1 %1905, %v1109_v17   ;;  %v709_v58 = vpop.permute.xlu0 %708 }
  0xe7   : > { %1688 = vmatprep.mubr.msk.f32.mxu0 %vm716_vm0, %v666_v59 }
  0xe9   : > { %1380 = vperm.xlu0 %1903, %v1377_v18  }
  0xea   : > { %1689 = vmatmul.mubr.msk.f32.gmra.mrb[6].mxu0 %vm716_vm0, %v667_v60  ;;  %1148 = vperm.xlu1 %1905, %v1110_v3   ;;  %v932_v17 = vpop.permute.xlu1 %931 }
  0xeb   : > { %1735 = vmatprep.mubr.msk.f32.mxu0 %vm716_vm0, %v1175_v15 }
  0xee   : > { %1198 = vperm.xlu1 %1905, %v1184_v19  }
  0xf2   : > { %1208 = vperm.xlu1 %1905, %v1186_v8  }
  0xf6   : > { %1218 = vperm.xlu1 %1905, %v1188_v20  }
  0xfa   : > { %1228 = vperm.xlu1 %1905, %v1190_v21  }
 0x132   : > { %v891_v18 = vpop.permute.xlu1 %890  ;;  %v928_v20 = vpop.permute.xlu0 %927 }
 0x137   : > { %v936_v3 = vpop.permute.xlu1 %935 }
 0x13b   : > { %v940_v19 = vpop.permute.xlu1 %939 }
 0x141   : > { %v1119_v8 = vpop.permute.xlu1 %1118 }
 0x145   : > { %v906_v21 = vpop.permute.xlu1 %905 }
 0x1b1   : > { %v1681_v25 = vpop.f32.mrb[0].mxu0 }
 0x1b2   : > { %v813_v27 = vadd.f32 %v1681_v25, %v684_v22  ;;  %v807_v28 = vpop.f32.mrb[1].mxu0  ;;  %v944_v22 = vpop.permute.xlu0 %943 }
 0x1b3   : > { %v808_v29 = vadd.f32 %v807_v28, %v679_v23  ;;  %v948_v23 = vpop.permute.xlu1 %947 }
 0x1b4   : > { %v847_v30 = vmul.f32 0.1, %v813_v27 }
 0x1b5   : > { %v846_v31 = vmul.f32 0.1, %v808_v29  ;;  %v1684_v32 = vpop.f32.mrb[2].mxu0 }
 0x1b6   : > { %v855_v36 = vmax.f32 %v813_v27, %v847_v30  ;;  %v823_v38 = vadd.f32 %v1684_v32, %v694_v24  ;;  %v817_v39 = vpop.f32.mrb[3].mxu0  ;;  %v952_v24 = vpop.permute.xlu0 %951  ;;  %v958_v32 = vmul.f32 %v928_v20, %v2215_v42 }
 0x1b7   : > { %v854_v43 = vmax.f32 %v808_v29, %v846_v31  ;;  %v818_v33 = vadd.f32 %v817_v39, %v689_v26  ;;  %v1124_v25 = vpop.permute.xlu1 %1123  ;;  %v959_v31 = vmul.f32 %v932_v17, %v2215_v42  ;;  %v919_v39 = vmul.f32 %v886_v16, %v2213_v41 }
 0x1b8   : > { %v849_v45 = vmul.f32 0.1, %v823_v38 }
 0x1b9   : > { %v848_v46 = vmul.f32 0.1, %v818_v33  ;;  %v1687_v47 = vpop.f32.mrb[4].mxu0  ;;  %v1782_v48 = vpack.c.bf16 %v855_v36, %v854_v43  ;;  %v961_v43 = vmul.f32 %v940_v19, %v2215_v42 }
 0x1ba   : > { %v857_v49 = vmax.f32 %v823_v38, %v849_v45  ;;  %v833_v50 = vadd.f32 %v1687_v47, %v704_v40  ;;  %v827_v35 = vpop.f32.mrb[5].mxu0  ;;  %v881_v26 = vpop.permute.xlu0 %880  ;;  %v920_v45 = vmul.f32 %v891_v18, %v2213_v41 }
 0x1bb   : > { %v856_v51 = vmax.f32 %v818_v33, %v848_v46  ;;  %v828_v52 = vadd.f32 %v827_v35, %v699_v44  ;;  %1783 = vmatprep.subr.bf16.mxu1 %v1782_v48  ;;  %v911_v27 = vpop.permute.xlu1 %910  ;;  %v918_v36 = vmul.f32 %v881_v26, %v2213_v41  ;;  %v967_v44 = vadd.f32 %v959_v31, %v919_v39 }
 0x1bc   : > { %v851_v53 = vmul.f32 0.1, %v833_v50  ;;  %1785 = vmatpush3.bf16.msra.mxu1 %v1782_v48  ;;  %v960_v46 = vmul.f32 %v936_v3, %v2215_v42 }
 0x1bd   : > { %v850_v55 = vmul.f32 0.1, %v828_v52  ;;  %v1690_v56 = vpop.f32.mrb[6].mxu0  ;;  %v1786_v57 = vpack.c.bf16 %v857_v49, %v856_v51  ;;  %v966_v48 = vadd.f32 %v958_v32, %v918_v36 }
 0x1be   : > { %v859_v59 = vmax.f32 %v833_v50, %v851_v53  ;;  %v843_v60 = vadd.f32 %v1690_v56, %v714_v54  ;;  %v837_v61 = vpop.f32.mrb[7].mxu0  ;;  %v896_v28 = vpop.permute.xlu0 %895  ;;  %v963_v53 = vmul.f32 %v948_v23, %v2215_v42  ;;  %v962_v56 = vmul.f32 %v944_v22, %v2215_v42 }
 0x1bf   : > { %v858_v62 = vmax.f32 %v828_v52, %v850_v55  ;;  %v838_v63 = vadd.f32 %v837_v61, %v709_v58  ;;  %1787 = vmatprep.subr.bf16.mxu1 %v1786_v57  ;;  %v916_v29 = vpop.permute.xlu1 %915  ;;  %v921_v33 = vmul.f32 %v896_v28, %v2213_v41  ;;  %v923_v52 = vmul.f32 %v906_v21, %v2213_v41 }
 0x1c0   : > { %v853_v0 = vmul.f32 0.1, %v843_v60  ;;  %1789 = vmatpush3.bf16.msra.mxu1 %v1786_v57  ;;  %v968_v61 = vadd.f32 %v960_v46, %v920_v45 }
 0x1c1   : > { %v852_v1 = vmul.f32 0.1, %v838_v63  ;;  %v1790_v2 = vpack.c.bf16 %v859_v59, %v858_v62  ;;  %v969_v55 = vadd.f32 %v961_v43, %v921_v33 }
 0x1c2   : > { %v861_v4 = vmax.f32 %v843_v60, %v853_v0  ;;  %v1114_v30 = vpop.permute.xlu0 %1113 }
 0x1c3   : > { %v860_v5 = vmax.f32 %v838_v63, %v852_v1  ;;  %1791 = vmatprep.subr.bf16.mxu1 %v1790_v2  ;;  %v956_v38 = vpop.permute.xlu1 %955  ;;  %v964_v1 = vmul.f32 %v952_v24, %v2215_v42 }
 0x1c4   : > { %1793 = vmatpush3.bf16.msra.mxu1 %v1790_v2  ;;  %v925_v2 = vmul.f32 %v916_v29, %v2213_v41 }
 0x1c5   : > { %v1794_v6 = vpack.c.bf16 %v861_v4, %v860_v5 }
 0x1c6   : > { %v901_v40 = vpop.permute.xlu0 %900 }
 0x1c7   : > { %1795 = vmatprep.subr.bf16.mxu1 %v1794_v6  ;;  %v1134_v35 = vpop.permute.xlu1 %1133  ;;  %v922_v57 = vmul.f32 %v901_v40, %v2213_v41 }
 0x1c8   : > { %1797 = vmatpush3.bf16.msra.mxu1 %v1794_v6  ;;  %v965_v6 = vmul.f32 %v956_v38, %v2215_v42 }
 0x1c9   : > { %v970_v16 = vadd.f32 %v962_v56, %v922_v57  ;;  %v1990_v56 = vmov 0.0  }
 0x1ca   : > { %v1129_v58 = vpop.permute.xlu0 %1128  ;;  %v973_v42 = vadd.f32 %v965_v6, %v925_v2 }
 0x1cb   : > { %1708 = vmatmul.mubr.msk.f32.vlgmr.msra.gmra.mrb[0].mxu1 %vm716_vm0, %v863_v7 }
 0x1cc   : > { %1710 = vmatprep.mubr.msk.f32.mxu1 %vm716_vm0, %v864_v9 }
 0x1ce   : > { %v1139_v19 = vpop.permute.xlu0 %1138 }
 0x1cf   : > { %1711 = vmatmul.mubr.msk.f32.gmra.mrb[2].mxu1 %vm716_vm0, %v865_v10  ;;  %v971_v10 = vadd.f32 %v963_v53, %v923_v52  ;;  %v1180_v52 = vld [vmem:[%s2474_s8 + $0x28] sm:$0xff]  ;;  %v1181_v53 = vld [vmem:[%s2474_s8 + $0x30] sm:$0xff] }
 0x1d0   : > { %1713 = vmatprep.mubr.msk.f32.mxu1 %vm716_vm0, %v866_v11  ;;  %v924_v11 = vmul.f32 %v911_v27, %v2213_v41 }
 0x1d2   : > { %v972_v41 = vadd.f32 %v964_v1, %v924_v11 }
 0x1d3   : > { %1714 = vmatmul.mubr.msk.f32.gmra.mrb[4].mxu1 %vm716_vm0, %v867_v12  ;;  %v1144_v12 = vpop.permute.xlu1 %1143 }
 0x1d4   : > { %1716 = vmatprep.mubr.msk.f32.mxu1 %vm716_vm0, %v868_v13 }
 0x1d7   : > { %1717 = vmatmul.mubr.msk.f32.gmra.mrb[6].mxu1 %vm716_vm0, %v869_v14 }
 0x1d8   : > { %1763 = vmatprep.mubr.msk.f32.mxu1 %vm1989_vm1, %v1990_v56 }
 0x29e   : > { %v1709_v47 = vpop.f32.mrb[0].mxu1 }
 0x29f   : > { %v1070_v49 = vadd.f32 %v1709_v47, %v967_v44  ;;  %v1064_v50 = vpop.f32.mrb[1].mxu1 }
 0x2a0   : > { %v1065_v51 = vadd.f32 %v1064_v50, %v966_v48  ;;  %v1177_v50 = vld [vmem:[%s2474_s8 + $0x10] sm:$0xff] }
 0x2a1   : > { %v1152_v54 = vadd.f32 %v1119_v8, %v1070_v49  ;;  %v1176_v49 = vld [vmem:[%s2474_s8 + $0x8] sm:$0xff] }
 0x2a2   : > { %v1151_v59 = vadd.f32 %v1114_v30, %v1065_v51  ;;  %v1712_v60 = vpop.f32.mrb[2].mxu1  ;;  %v1149_v30 = vpop.permute.xlu1 %1148  ;;  %v1179_v51 = vld [vmem:[%s2474_s8 + $0x20] sm:$0xff] }
 0x2a3   : > { %v1160_v62 = vmul.f32 0.1, %v1152_v54  ;;  %v1080_v63 = vadd.f32 %v1712_v60, %v969_v55  ;;  %v1074_v0 = vpop.f32.mrb[3].mxu1  ;;  %v1988_v55 = vmov 0.0|0.0  }
 0x2a4   : > { %v1159_v4 = vmul.f32 0.1, %v1151_v59  ;;  %v1075_v5 = vadd.f32 %v1074_v0, %v968_v61  ;;  %1814 = vmatprep.subr.bf16.mxu1 %v1988_v55 }
 0x2a5   : > { %v1168_v7 = vmax.f32 %v1152_v54, %v1160_v62  ;;  %v1154_v9 = vadd.f32 %v1129_v58, %v1080_v63  ;;  %v1182_v54 = vld [vmem:[%s2474_s8 + $0x38] sm:$0xff]  ;;  %v1194_v58 = vpop.permute.xlu0 %1193 }
 0x2a6   : > { %v1167_v13 = vmax.f32 %v1151_v59, %v1159_v4  ;;  %v1153_v14 = vadd.f32 %v1124_v25, %v1075_v5  ;;  %v1715_v15 = vpop.f32.mrb[4].mxu1  ;;  %v1199_v57 = vpop.permute.xlu1 %1198 }
 0x2a7   : > { %v1162_v17 = vmul.f32 0.1, %v1154_v9  ;;  %v1090_v18 = vadd.f32 %v1715_v15, %v971_v10  ;;  %v1084_v3 = vpop.f32.mrb[5].mxu1 }
 0x2a8   : > { %v1161_v8 = vmul.f32 0.1, %v1153_v14  ;;  %v1085_v20 = vadd.f32 %v1084_v3, %v970_v16  ;;  %v1798_v21 = vpack.c.bf16 %v1168_v7, %v1167_v13 }
 0x2a9   : > { %v1170_v22 = vmax.f32 %v1154_v9, %v1162_v17  ;;  %v1156_v23 = vadd.f32 %v1139_v19, %v1090_v18  ;;  %v1204_v61 = vpop.permute.xlu0 %1203 }
 0x2aa   : > { %v1169_v24 = vmax.f32 %v1153_v14, %v1161_v8  ;;  %v1155_v26 = vadd.f32 %v1134_v35, %v1085_v20  ;;  %v1718_v28 = vpop.f32.mrb[6].mxu1  ;;  %1799 = vmatprep.subr.bf16.mxu0 %v1798_v21  ;;  %v1178_v35 = vld [vmem:[%s2474_s8 + $0x18] sm:$0xff]  ;;  %v1209_v59 = vpop.permute.xlu1 %1208 }
 0x2ab   : > { %v1164_v27 = vmul.f32 0.1, %v1156_v23  ;;  %v1100_v29 = vadd.f32 %v1718_v28, %v973_v42  ;;  %v1094_v25 = vpop.f32.mrb[7].mxu1  ;;  %1801 = vmatpush3.bf16.msra.mxu0 %v1798_v21 }
 0x2ac   : > { %v1163_v31 = vmul.f32 0.1, %v1155_v26  ;;  %v1095_v32 = vadd.f32 %v1094_v25, %v972_v41  ;;  %v1802_v36 = vpack.c.bf16 %v1170_v22, %v1169_v24 }
 0x2ad   : > { %v1172_v38 = vmax.f32 %v1156_v23, %v1164_v27  ;;  %v1158_v39 = vadd.f32 %v1149_v30, %v1100_v29 }
 0x2ae   : > { %v1171_v40 = vmax.f32 %v1155_v26, %v1163_v31  ;;  %v1157_v43 = vadd.f32 %v1144_v12, %v1095_v32  ;;  %1803 = vmatprep.subr.bf16.mxu0 %v1802_v36  ;;  %v1219_v9 = vpop.permute.xlu1 %1218  ;;  %v1214_v12 = vpop.permute.xlu0 %1213 }
 0x2af   : > { %v1166_v33 = vmul.f32 0.1, %v1158_v39  ;;  %1805 = vmatpush3.bf16.msra.mxu0 %v1802_v36 }
 0x2b0   : > { %v1165_v44 = vmul.f32 0.1, %v1157_v43  ;;  %v1806_v45 = vpack.c.bf16 %v1172_v38, %v1171_v40 }
 0x2b1   : > { %v1174_v46 = vmax.f32 %v1158_v39, %v1166_v33  ;;  %v1376_v39 = vld [vmem:[%s2476_s10] sm:$0x1] }
 0x2b2   : > { %v1173_v47 = vmax.f32 %v1157_v43, %v1165_v44  ;;  %1807 = vmatprep.subr.bf16.mxu0 %v1806_v45  ;;  %v1229_v21 = vpop.permute.xlu1 %1228  ;;  %v1224_v24 = vpop.permute.xlu0 %1223 }
 0x2b3   : > { %1809 = vmatpush3.bf16.msra.mxu0 %v1806_v45 }
 0x2b4   : > { %v1810_v48 = vpack.c.bf16 %v1174_v46, %v1173_v47 }
 0x2b6   : > { %1811 = vmatprep.subr.bf16.mxu0 %v1810_v48  ;;  %v1381_v40 = vpop.permute.xlu0 %1380 }
 0x2b7   : > { %1813 = vmatpush3.bf16.msra.mxu0 %v1810_v48  ;;  %v1386_v43 = vrot.slane %v1381_v40, %v526_v37 }
 0x2ba   : > { %1736 = vmatmul.mubr.msk.f32.vlgmr.msra.gmra.mrb[8].mxu0 %vm716_vm0, %v1176_v49 }
 0x2bb   : > { %1738 = vmatprep.mubr.msk.f32.mxu0 %vm716_vm0, %v1177_v50 }
 0x2be   : > { %1739 = vmatmul.mubr.msk.f32.gmra.mrb[10].mxu0 %vm716_vm0, %v1178_v35 }
 0x2bf   : > { %1741 = vmatprep.mubr.msk.f32.mxu0 %vm716_vm0, %v1179_v51 }
 0x2c2   : > { %1742 = vmatmul.mubr.msk.f32.gmra.mrb[12].mxu0 %vm716_vm0, %v1180_v52 }
 0x2c3   : > { %1744 = vmatprep.mubr.msk.f32.mxu0 %vm716_vm0, %v1181_v53 }
 0x2c6   : > { %1745 = vmatmul.mubr.msk.f32.gmra.mrb[14].mxu0 %vm716_vm0, %v1182_v54 }
 0x38d   : > { %v1737_v60 = vpop.f32.mrb[8].mxu0 }
 0x38e   : > { %v1327_v62 = vadd.f32 %v1737_v60, %v1199_v57  ;;  %v1321_v63 = vpop.f32.mrb[9].mxu0 }
 0x38f   : > { %v1322_v0 = vadd.f32 %v1321_v63, %v1194_v58 }
 0x390   : > { %v1361_v1 = vmul.f32 0.1, %v1327_v62 }
 0x391   : > { %v1360_v2 = vmul.f32 0.1, %v1322_v0  ;;  %v1740_v4 = vpop.f32.mrb[10].mxu0 }
 0x392   : > { %v1369_v5 = vmax.f32 %v1327_v62, %v1361_v1  ;;  %v1337_v6 = vadd.f32 %v1740_v4, %v1209_v59  ;;  %v1331_v7 = vpop.f32.mrb[11].mxu0 }
 0x393   : > { %v1368_v10 = vmax.f32 %v1322_v0, %v1360_v2  ;;  %v1332_v11 = vadd.f32 %v1331_v7, %v1204_v61 }
 0x394   : > { %v1363_v13 = vmul.f32 0.1, %v1337_v6 }
 0x395   : > { %v1815_v14 = vpack.c.bf16 %v1369_v5, %v1368_v10  ;;  %v1362_v15 = vmul.f32 0.1, %v1332_v11  ;;  %v1743_v16 = vpop.f32.mrb[12].mxu0 }
 0x396   : > { %v1371_v17 = vmax.f32 %v1337_v6, %v1363_v13  ;;  %v1347_v18 = vadd.f32 %v1743_v16, %v1219_v9  ;;  %v1341_v3 = vpop.f32.mrb[13].mxu0 }
 0x397   : > { %v1370_v19 = vmax.f32 %v1332_v11, %v1362_v15  ;;  %v1342_v8 = vadd.f32 %v1341_v3, %v1214_v12  ;;  %1816 = vmatpush3.bf16.msra.mxu1 %v1815_v14 }
 0x398   : > { %v1365_v20 = vmul.f32 0.1, %v1347_v18  ;;  %1817 = vmatprep.subr.bf16.mxu1 %v1988_v55 }
 0x399   : > { %v1818_v22 = vpack.c.bf16 %v1371_v17, %v1370_v19  ;;  %v1364_v23 = vmul.f32 0.1, %v1342_v8  ;;  %v1746_v42 = vpop.f32.mrb[14].mxu0 }
 0x39a   : > { %v1373_v26 = vmax.f32 %v1347_v18, %v1365_v20  ;;  %v1357_v28 = vadd.f32 %v1746_v42, %v1229_v21  ;;  %v1351_v41 = vpop.f32.mrb[15].mxu0 }
 0x39b   : > { %v1372_v27 = vmax.f32 %v1342_v8, %v1364_v23  ;;  %v1352_v29 = vadd.f32 %v1351_v41, %v1224_v24  ;;  %1819 = vmatpush3.bf16.msra.mxu1 %v1818_v22 }
 0x39c   : > { %v1367_v25 = vmul.f32 0.1, %v1357_v28  ;;  %1820 = vmatprep.subr.bf16.mxu1 %v1988_v55 }
 0x39d   : > { %v1821_v30 = vpack.c.bf16 %v1373_v26, %v1372_v27  ;;  %v1366_v31 = vmul.f32 0.1, %v1352_v29 }
 0x39e   : > { %v1375_v32 = vmax.f32 %v1357_v28, %v1367_v25 }
 0x39f   : > { %v1374_v36 = vmax.f32 %v1352_v29, %v1366_v31  ;;  %1822 = vmatpush3.bf16.msra.mxu1 %v1821_v30 }
 0x3a0   : > { %1823 = vmatprep.subr.bf16.mxu1 %v1988_v55 }
 0x3a1   : > { %v1824_v38 = vpack.c.bf16 %v1375_v32, %v1374_v36 }
 0x3a3   : > { %1825 = vmatpush3.bf16.msra.mxu1 %v1824_v38 }
 0x3a6   : > { %1764 = vmatmul.mubr.msk.f32.vlgmr.msra.gmra.mrb[8].mxu1 %vm716_vm0, %v1376_v39 }
 0x479   : > { %v1456_v33 = vpop.f32.mrb[8].mxu1 }
 0x47a   : > { %v1457_v44 = vadd.f32 %v1456_v33, %v1386_v43  ;;  %v1765_v45 = vpop.f32.mrb[9].mxu1 }
 0x47c   : > { %1460 = vst [vmem:[%s457_s11] sm:$0x1] %v1457_v44 }
 0x47d   : > { %1919 = shalt.err (!%p1916_p5)
}
 0x47e   : > { %s1920_s13 = scalar_lea.hbm %s2419_s22, 16  ;;  %s1924_s29 = scalar_lea.hbm %s2478_s12, 32 }
 0x47f   : > { %p1921_p6 = scmp.ne.s32.totalorder %s2419_s22, %s1920_s13  ;;  %p1925_p10 = scmp.lt.u32.totalorder %s2419_s22, %s2478_s12 }
 0x480   : > { %p1926_p11 = scmp.lt.u32.totalorder %s1924_s29, %s1920_s13  ;;  %p1928_p13 = scmp.lt.u32.totalorder %s1920_s13, %s2419_s22 }
 0x481   : > { %p1922_p7 = pnand %p1921_p6, %p2100_p4 }
 0x482   : > { %p1927_p12 = por %p1926_p11, %p1925_p10 }
 0x483   : > { %p1923_p9 = pneg %p1922_p7 }
 0x484   : > { %p1929_p0 = por %p1928_p13, %p1927_p12 }
 0x486   : > { %p1930_p1 = pnand %p1929_p0, %p1923_p9 }
 0x488   : > { %1933 = shalt.err (!%p1930_p1)
}
 0x489   : > { %1826 = dma.vmem_to_hbm [thread:$0]  (%p2100_p4), %s2421_s21, 16, %s2419_s22, %s1462_s26  }
 0x48a PF: > { %p1832_p2 = scmp.ge.s32.totalorder %s1984_s28, 2  ;;  %s1487_s15 = sand.u32 1, %s1964_s23  }
 0x48b   : > { %s1488_s19 = scalar_lea.sflag [#allocation4], %s1487_s15 }
 0x48c   : > { %p1829_p3 = pnand %p1832_p2, %p2107_p8 }
 0x48e   : > { %1959 = dma.done.wait (!%p1829_p3), %s1488_s19, 16  }
 0x48f   : > { %1961 = vsyncadd (!%p1829_p3), %s1488_s19, 4294967280  ;;  %s27_s28 = sadd.s32 1, %s1984_s28   ;;  %s2487_s23 = smov %s1968_s24 }
 0x490   : > { %p24_p5 = scmp.ge.s32.totalorder %s27_s28, 4   ;;  %s2488_s24 = smov %s1972_s25 }
 0x491   : > { %s2489_s25 = smov %s2113_s17  ;;  %s2490_s26 = smov %s1980_s27 }
 0x492   : > { %s2491_s27 = smov %s2493_s30  ;;  %26 = sbr.rel (!%p24_p5) target bundleno = 7 (0x7), region = 109 }
 0x499   :  { %1492 = vsyncpa [#allocation4], 1 }
 0x49a   :  { %1494 = vsyncpa [#allocation4 + $0x1], 1 }

</bundles_post_ra>
